<compile_context>
chip_gen: v7x
topology: tpu7x:2x2x1
jax: 0.10.0
libtpu: 0.0.40
codegen_flags: <defaults>
</compile_context>

<pallas_src>
import jax
import jax.numpy as jnp
from jax.experimental import pallas as pl
from jax.experimental.pallas import tpu as pltpu


def _stats_kernel(x_ref, sum_ref, sq_ref):
    """Accumulate per-channel sum / sum-of-squares over row tiles.

    x_ref:   (TN, C, HW) block (HW on lanes, C on sublanes).
    sum_ref: (1, 1, C) accumulator, resident across grid axis 1 (reduction).
    sq_ref:  (1, 1, C) accumulator.
    """
    @pl.when(pl.program_id(1) == 0)
    def _():
        sum_ref[...] = jnp.zeros_like(sum_ref)
        sq_ref[...] = jnp.zeros_like(sq_ref)

    x = x_ref[...].astype(jnp.float32)
    c = x.shape[1]
    # Reduce the leading (sample) axis first: pure VPU vreg adds, no relayout.
    # Then a single cross-lane (XLU) reduce of the small (C, HW) partials.
    s_part = jnp.sum(x, axis=0)          # (C, HW)
    q_part = jnp.sum(x * x, axis=0)      # (C, HW)
    sum_ref[...] += jnp.sum(s_part, axis=1).reshape(1, 1, c)
    sq_ref[...] += jnp.sum(q_part, axis=1).reshape(1, 1, c)


def _normalize_kernel(x_ref, scale_ref, shift_ref, o_ref):
    """y = x * scale + shift with per-channel (1, C, 1) scale/shift."""
    x = x_ref[...].astype(jnp.float32)            # (TN, C, HW)
    o_ref[...] = (x * scale_ref[...] + shift_ref[...]).astype(o_ref.dtype)


def _pick_row_tile(n_rows, row_bytes, target_bytes):
    """Largest divisor of n_rows whose block is <= target_bytes (>=1 row)."""
    tn = int(max(1, min(n_rows, target_bytes // max(row_bytes, 1))))
    while n_rows % tn:
        tn -= 1
    return tn


def tebn_forward(x, gamma, beta, T, eps=1e-5,
                 target_block_bytes=2 * 1024 * 1024):
    """x: (T*B, C, H, W); gamma/beta: (C,).  Returns same shape/dtype as x."""
    N, C, H, W = x.shape
    assert N % T == 0, "leading dim must be T*B"
    HW = H * W
    count = float(N * HW)  # BN3d stats: per channel over (B, T, H, W)

    # Free reshape (collapses trailing contiguous dims) -> channels on
    # sublanes, spatial on lanes.  No transposes anywhere.
    x3 = x.reshape(N, C, HW)

    row_bytes = C * HW * x.dtype.itemsize
    tn = _pick_row_tile(N, row_bytes, target_block_bytes)
    n_tiles = N // tn
    # Split the stats reduction so v7x's two TensorCores both work; harmless
    # on single-core chips (v5e/v6e).
    n_splits = 2 if (n_tiles >= 2 and n_tiles % 2 == 0) else 1
    tiles_per_split = n_tiles // n_splits

    # ---- Pass 1: per-channel sum / sum-of-squares --------------------------
    psums, psqs = pl.pallas_call(
        _stats_kernel,
        out_shape=(jax.ShapeDtypeStruct((n_splits, 1, C), jnp.float32),
                   jax.ShapeDtypeStruct((n_splits, 1, C), jnp.float32)),
        grid_spec=pltpu.PrefetchScalarGridSpec(
            num_scalar_prefetch=0,
            grid=(n_splits, tiles_per_split),
            in_specs=[pl.BlockSpec(
                (tn, C, HW),
                lambda s, n, tps=tiles_per_split: (s * tps + n, 0, 0))],
            out_specs=(pl.BlockSpec((1, 1, C), lambda s, n: (s, 0, 0)),
                       pl.BlockSpec((1, 1, C), lambda s, n: (s, 0, 0)))),
        compiler_params=pltpu.CompilerParams(
            dimension_semantics=("parallel", "arbitrary")),
    )(x3)

    # Tiny (C,)-sized epilogue in plain JAX: fold split partials, then fold
    # mean/var/gamma/beta into a single per-channel scale & shift so pass 2 is
    # one FMA per element.
    sums = jnp.sum(psums, axis=0).reshape(C)
    sqs = jnp.sum(psqs, axis=0).reshape(C)
    mean = sums / count
    # NOTE: E[x^2]-E[x]^2 accumulated in f32 (biased/training-mode variance,
    # clamped at 0).  For bf16 inputs with very large N*H*W a centered second
    # accumulation pass would be numerically safer.
    var = jnp.maximum(sqs / count - mean * mean, 0.0)
    rstd = jax.lax.rsqrt(var + eps)
    scale = gamma.astype(jnp.float32) * rstd               # (C,)
    shift = beta.astype(jnp.float32) - mean * scale        # (C,)
    scale = scale.reshape(1, C, 1)
    shift = shift.reshape(1, C, 1)

    # ---- Pass 2: elementwise normalize + affine (lane-dense, parallel) -----
    y3 = pl.pallas_call(
        _normalize_kernel,
        out_shape=jax.ShapeDtypeStruct((N, C, HW), x.dtype),
        grid_spec=pltpu.PrefetchScalarGridSpec(
            num_scalar_prefetch=0,
            grid=(n_tiles,),
            in_specs=[pl.BlockSpec((tn, C, HW), lambda n: (n, 0, 0)),
                      pl.BlockSpec((1, C, 1), lambda n: (0, 0, 0)),
                      pl.BlockSpec((1, C, 1), lambda n: (0, 0, 0))],
            out_specs=pl.BlockSpec((tn, C, HW), lambda n: (n, 0, 0))),
        compiler_params=pltpu.CompilerParams(
            dimension_semantics=("parallel",)),
    )(x3, scale, shift)

    # Free reshape back to NCHW.
    return y3.reshape(N, C, H, W)


if __name__ == "__main__":
    T, B, C, H, W = 4, 2, 8, 16, 16
    key = jax.random.PRNGKey(0)
    x = jax.random.normal(key, (T * B, C, H, W), dtype=jnp.float32)
    # Give each channel a distinct mean/variance so the normalization is
    # actually exercised.
    x = x * 2.0 + jnp.arange(C, dtype=jnp.float32).reshape(1, C, 1, 1)

    # Parameter init matching nn.BatchNorm3d inside TEBN.__init__:
    gamma = jnp.ones((C,), jnp.float32)   # bn.weight
    beta = jnp.zeros((C,), jnp.float32)   # bn.bias
    # TODO(synk): self.p = ones(4,1,1,1,1) is declared but never used by
    # TEBN.forward, so it is intentionally not consumed here.

    y = jax.block_until_ready(tebn_forward(x, gamma, beta, T))

    # Pure-JAX reference of the PyTorch forward (training-mode BN, biased var).
    mean = jnp.mean(x, axis=(0, 2, 3), keepdims=True)
    var = jnp.mean((x - mean) ** 2, axis=(0, 2, 3), keepdims=True)
    ref = (x - mean) / jnp.sqrt(var + 1e-5) * gamma.reshape(1, C, 1, 1) \
          + beta.reshape(1, C, 1, 1)

    assert y.shape == x.shape and y.dtype == x.dtype
    assert jnp.allclose(y, ref, atol=1e-4, rtol=1e-4), "mismatch vs reference"
    print("KERNEL_OK")
</pallas_src>

<mosaic_0001>
module attributes {stable_mosaic.version = 11 : i64} {
  func.func @_stats_kernel(%arg0: i32, %arg1: i32, %arg2: memref<8x8x256xf32, #tpu.memory_space<vmem>>, %arg3: memref<1x1x8xf32, #tpu.memory_space<vmem>>, %arg4: memref<1x1x8xf32, #tpu.memory_space<vmem>>) attributes {dimension_semantics = [#tpu.dimension_semantics<parallel>, #tpu.dimension_semantics<arbitrary>], iteration_bounds = array<i64: 1, 1>, scalar_prefetch = 0 : i64, scratch_operands = 0 : i64, tpu.core_type = #tpu.core_type<tc>, window_params = [{transform_indices = @transform_0, window_bounds = array<i64: 8, 8, 256>}, {transform_indices = @transform_1, window_bounds = array<i64: 1, 1, 8>}, {transform_indices = @transform_2, window_bounds = array<i64: 1, 1, 8>}]} {
    %c0_i32 = arith.constant 0 : i32
    %0 = arith.cmpi eq, %arg1, %c0_i32 : i32
    %1 = arith.extui %0 : i1 to i32
    %c0_i32_0 = arith.constant 0 : i32
    %2 = arith.cmpi ne, %1, %c0_i32_0 : i32
    scf.if %2 {
      %cst_18 = arith.constant 0.000000e+00 : f32
      %17 = vector.broadcast %cst_18 : f32 to vector<1x1x8xf32>
      %c0_19 = arith.constant 0 : index
      %c0_20 = arith.constant 0 : index
      %c0_21 = arith.constant 0 : index
      %18 = vector.load %arg3[%c0_19, %c0_20, %c0_21] : memref<1x1x8xf32, #tpu.memory_space<vmem>>, vector<1x1x8xf32>
      tpu.vector_store %arg3[%c0_19, %c0_20, %c0_21], %17 {strides = array<i32>} : memref<1x1x8xf32, #tpu.memory_space<vmem>>, vector<1x1x8xf32>,
      %cst_22 = arith.constant 0.000000e+00 : f32
      %19 = vector.broadcast %cst_22 : f32 to vector<1x1x8xf32>
      %c0_23 = arith.constant 0 : index
      %c0_24 = arith.constant 0 : index
      %c0_25 = arith.constant 0 : index
      %20 = vector.load %arg4[%c0_23, %c0_24, %c0_25] : memref<1x1x8xf32, #tpu.memory_space<vmem>>, vector<1x1x8xf32>
      tpu.vector_store %arg4[%c0_23, %c0_24, %c0_25], %19 {strides = array<i32>} : memref<1x1x8xf32, #tpu.memory_space<vmem>>, vector<1x1x8xf32>,
    } else {
    }
    %c0 = arith.constant 0 : index
    %c0_1 = arith.constant 0 : index
    %c0_2 = arith.constant 0 : index
    %3 = vector.load %arg2[%c0, %c0_1, %c0_2] : memref<8x8x256xf32, #tpu.memory_space<vmem>>, vector<8x8x256xf32>
    %cst = arith.constant dense<0.000000e+00> : vector<8x256xf32>
    %4 = vector.multi_reduction <add>, %3, %cst [0] : vector<8x8x256xf32> to vector<8x256xf32>
    %5 = arith.mulf %3, %3 : vector<8x8x256xf32>
    %cst_3 = arith.constant dense<0.000000e+00> : vector<8x256xf32>
    %6 = vector.multi_reduction <add>, %5, %cst_3 [0] : vector<8x8x256xf32> to vector<8x256xf32>
    %c0_4 = arith.constant 0 : index
    %c0_5 = arith.constant 0 : index
    %c0_6 = arith.constant 0 : index
    %7 = vector.load %arg3[%c0_4, %c0_5, %c0_6] : memref<1x1x8xf32, #tpu.memory_space<vmem>>, vector<1x1x8xf32>
    %cst_7 = arith.constant dense<0.000000e+00> : vector<8xf32>
    %8 = vector.multi_reduction <add>, %4, %cst_7 [1] : vector<8x256xf32> to vector<8xf32>
    %9 = vector.shape_cast %8 : vector<8xf32> to vector<1x1x8xf32>
    %10 = arith.addf %7, %9 : vector<1x1x8xf32>
    %c0_8 = arith.constant 0 : index
    %c0_9 = arith.constant 0 : index
    %c0_10 = arith.constant 0 : index
    %11 = vector.load %arg3[%c0_8, %c0_9, %c0_10] : memref<1x1x8xf32, #tpu.memory_space<vmem>>, vector<1x1x8xf32>
    tpu.vector_store %arg3[%c0_8, %c0_9, %c0_10], %10 {strides = array<i32>} : memref<1x1x8xf32, #tpu.memory_space<vmem>>, vector<1x1x8xf32>,
    %c0_11 = arith.constant 0 : index
    %c0_12 = arith.constant 0 : index
    %c0_13 = arith.constant 0 : index
    %12 = vector.load %arg4[%c0_11, %c0_12, %c0_13] : memref<1x1x8xf32, #tpu.memory_space<vmem>>, vector<1x1x8xf32>
    %cst_14 = arith.constant dense<0.000000e+00> : vector<8xf32>
    %13 = vector.multi_reduction <add>, %6, %cst_14 [1] : vector<8x256xf32> to vector<8xf32>
    %14 = vector.shape_cast %13 : vector<8xf32> to vector<1x1x8xf32>
    %15 = arith.addf %12, %14 : vector<1x1x8xf32>
    %c0_15 = arith.constant 0 : index
    %c0_16 = arith.constant 0 : index
    %c0_17 = arith.constant 0 : index
    %16 = vector.load %arg4[%c0_15, %c0_16, %c0_17] : memref<1x1x8xf32, #tpu.memory_space<vmem>>, vector<1x1x8xf32>
    tpu.vector_store %arg4[%c0_15, %c0_16, %c0_17], %15 {strides = array<i32>} : memref<1x1x8xf32, #tpu.memory_space<vmem>>, vector<1x1x8xf32>,
    return
  }
  func.func @transform_0(%arg0: i32, %arg1: i32) -> (i32, i32, i32) {
    %c1_i32 = arith.constant 1 : i32
    %0 = arith.muli %arg0, %c1_i32 : i32
    %1 = arith.addi %0, %arg1 : i32
    %c0_i32 = arith.constant 0 : i32
    %c0_i32_0 = arith.constant 0 : i32
    %c0_i32_1 = arith.constant 0 : i32
    return %1, %c0_i32, %c0_i32_0 : i32, i32, i32
  }
  func.func @transform_1(%arg0: i32, %arg1: i32) -> (i32, i32, i32) {
    %c0_i32 = arith.constant 0 : i32
    %c0_i32_0 = arith.constant 0 : i32
    %c0_i32_1 = arith.constant 0 : i32
    return %arg0, %c0_i32, %c0_i32_0 : i32, i32, i32
  }
  func.func @transform_2(%arg0: i32, %arg1: i32) -> (i32, i32, i32) {
    %c0_i32 = arith.constant 0 : i32
    %c0_i32_0 = arith.constant 0 : i32
    %c0_i32_1 = arith.constant 0 : i32
    return %arg0, %c0_i32, %c0_i32_0 : i32, i32, i32
  }
}

</mosaic_0001>

<bundles_post_ra>
// kernel: tpu_custom_call.1
= control target key start
LH: loop header
LB: loop body
LE: loop exit
PB: predicated region body
PF: predicated region fallthrough
CT: control target
= control target key end

     0   :  { %8 = vsyncpa [#allocation3], 0  ;;  %s519_s0 = inlined_call_operand.hbm [shape: f32[8,8,256], index: 0, kind: input, shape index: {}]   ;;  %s520_s1 = inlined_call_operand.hbm [shape: f32[1,1,8], index: 1, kind: output, shape index: {0}]   ;;  %s521_s2 = inlined_call_operand.hbm [shape: f32[1,1,8], index: 2, kind: output, shape index: {1}]  }
   0x1   :  { %9 = vsyncpa [#allocation4], 0 }
   0x2   :  { %10 = vsyncpa [#allocation7], 0  ;;  %s434_s9 = smov [#allocation2]   ;;  %s362_s13 = scalar_lea.hbm %s519_s0, 2048 }
   0x3   :  { %s21_s10 = sshll.u32 %s434_s9, 4  ;;  %p363_p0 = scmp.ne.s32.totalorder %s519_s0, %s362_s13  ;;  %s22_s10 = int_to_ptr.vmem [resolvable:$true] %s21_s10 }
   0x4   :  { %p366_p1 = scmp.lt.u32.totalorder %s362_s13, %s519_s0 }
   0x6   :  { %p368_p2 = pnand %p366_p1, %p363_p0 }
   0x8   :  { %371 = shalt.err (!%p368_p2)
}
   0x9   :  { %s372_s18 = scalar_lea.vmem %s22_s10, 2048  ;;  %p377_p4 = scmp.lt.s32.totalorder %s22_s10, %s22_s10 }
   0xa   :  { %p373_p3 = scmp.ne.s32.totalorder %s22_s10, %s372_s18  ;;  %p378_p5 = scmp.lt.s32.totalorder %s372_s18, %s372_s18 }
   0xc   :  { %p379_p6 = por %p378_p5, %p377_p4 }
   0xe   :  { %p380_p7 = pnand %p379_p6, %p373_p3 }
  0x10   :  { %383 = shalt.err (!%p380_p7)
}
  0x11   :  { %s435_s19 = smov 256   ;;  %s436_s20 = smov 16  }
  0x12   :  { %27 = dma.hbm_to_vmem [thread:$0]  %s519_s0, 2048, %s22_s10, [#allocation3], %s435_s19, %s435_s19, %s436_s20  }
  0x13   :  { %428 = dma.done.wait [#allocation3], 2048  }
  0x14   :  { %429 = vsyncadd [#allocation3], 4294965248  ;;  %v40_v0 = vld [vmem:[#allocation2] sm:$0xff]  ;;  %v41_v1 = vld [vmem:[#allocation2 + $0x8] sm:$0xff]  ;;  %v437_v62 = vmov 0   ;;  %v105_v63 = vlaneseq  ;;  %vm37_vm0 = vcmask 57344  }
  0x15   :  { %v42_v2 = vld [vmem:[#allocation2 + $0x10] sm:$0xff]  ;;  %v43_v3 = vld [vmem:[#allocation2 + $0x18] sm:$0xff]  ;;  %v44_v4 = vld [vmem:[#allocation2 + $0x20] sm:$0xff]  ;;  %v70_v7 = vmul.f32 %v40_v0, %v40_v0  ;;  %v71_v10 = vmul.f32 %v41_v1, %v41_v1  ;;  %360 = vset.pattern.permute.xlu1 %v437_v62  ;;  %361 = vset.pattern.permute.xlu0 %v437_v62  ;;  %s440_s0 = smov [#allocation5]   ;;  %s441_s24 = smov [#allocation6]  }
  0x16   :  { %v45_v5 = vld [vmem:[#allocation2 + $0x28] sm:$0xff]  ;;  %v56_v6 = vadd.f32 %v42_v2, %v40_v0  ;;  %v46_v8 = vld [vmem:[#allocation2 + $0x30] sm:$0xff]  ;;  %v63_v9 = vadd.f32 %v43_v3, %v41_v1  ;;  %v72_v11 = vmul.f32 %v42_v2, %v42_v2  ;;  %v73_v12 = vmul.f32 %v43_v3, %v43_v3  ;;  %v47_v13 = vld [vmem:[#allocation2 + $0x38] sm:$0xff]  ;;  %s329_s23 = sshll.u32 %s440_s0, 4  ;;  %s339_s25 = sshll.u32 %s441_s24, 4  ;;  %s330_s23 = int_to_ptr.vmem [resolvable:$true] %s329_s23  ;;  %s340_s25 = int_to_ptr.vmem [resolvable:$true] %s339_s25 }
  0x17   :  { %v48_v15 = vld [vmem:[#allocation2 + $0x40] sm:$0xff]  ;;  %v74_v17 = vmul.f32 %v44_v4, %v44_v4  ;;  %v75_v18 = vmul.f32 %v45_v5, %v45_v5  ;;  %v49_v19 = vld [vmem:[#allocation2 + $0x48] sm:$0xff]  ;;  %v76_v21 = vmul.f32 %v46_v8, %v46_v8  ;;  %v50_v22 = vld [vmem:[#allocation2 + $0x50] sm:$0xff]  ;;  %v77_v24 = vmul.f32 %v47_v13, %v47_v13  ;;  %s384_s26 = scalar_lea.vmem %s330_s23, 16  ;;  %s388_s27 = scalar_lea.vmem %s330_s23, 32 }
  0x18   :  { %v57_v14 = vadd.f32 %v56_v6, %v44_v4  ;;  %v64_v16 = vadd.f32 %v63_v9, %v45_v5  ;;  %v86_v25 = vadd.f32 %v72_v11, %v70_v7  ;;  %v93_v26 = vadd.f32 %v73_v12, %v71_v10  ;;  %v51_v27 = vld [vmem:[#allocation2 + $0x58] sm:$0xff]  ;;  %v52_v30 = vld [vmem:[#allocation2 + $0x60] sm:$0xff]  ;;  %v53_v35 = vld [vmem:[#allocation2 + $0x68] sm:$0xff]  ;;  %p385_p8 = scmp.ne.s32.totalorder %s330_s23, %s384_s26  ;;  %p389_p9 = scmp.lt.s32.totalorder %s330_s23, %s330_s23 }
  0x19   :  { %v78_v29 = vmul.f32 %v48_v15, %v48_v15  ;;  %v79_v32 = vmul.f32 %v49_v19, %v49_v19  ;;  %v80_v37 = vmul.f32 %v50_v22, %v50_v22  ;;  %v54_v38 = vld [vmem:[#allocation2 + $0x70] sm:$0xff]  ;;  %v81_v40 = vmul.f32 %v51_v27, %v51_v27  ;;  %v55_v43 = vld [vmem:[#allocation2 + $0x78] sm:$0xff]  ;;  %p390_p10 = scmp.lt.s32.totalorder %s388_s27, %s384_s26 }
  0x1a   :  { %v58_v20 = vadd.f32 %v57_v14, %v46_v8  ;;  %v65_v23 = vadd.f32 %v64_v16, %v47_v13  ;;  %v87_v33 = vadd.f32 %v86_v25, %v74_v17  ;;  %v94_v34 = vadd.f32 %v93_v26, %v75_v18 }
  0x1b   :  { %v82_v45 = vmul.f32 %v52_v30, %v52_v30  ;;  %v83_v47 = vmul.f32 %v53_v35, %v53_v35  ;;  %v84_v51 = vmul.f32 %v54_v38, %v54_v38  ;;  %v85_v53 = vmul.f32 %v55_v43, %v55_v43  ;;  %p391_p11 = por %p390_p10, %p389_p9 }
  0x1c   :  { %v59_v28 = vadd.f32 %v58_v20, %v48_v15  ;;  %v66_v31 = vadd.f32 %v65_v23, %v49_v19  ;;  %v88_v41 = vadd.f32 %v87_v33, %v76_v21  ;;  %v95_v42 = vadd.f32 %v94_v34, %v77_v24 }
  0x1d   :  { %v106_v0 = vshrl.u32 %v105_v63, 7  ;;  %v190_v1 = vand.u32 127, %v105_v63  ;;  %v438_v2 = vmov 0.0   ;;  %v439_v4 = vmov 1966171168   ;;  %p392_p12 = pnand %p391_p11, %p385_p8 }
  0x1e   :  { %v60_v36 = vadd.f32 %v59_v28, %v50_v22  ;;  %v67_v39 = vadd.f32 %v66_v31, %v51_v27  ;;  %v89_v48 = vadd.f32 %v88_v41, %v78_v29  ;;  %v96_v49 = vadd.f32 %v95_v42, %v79_v32  ;;  %38 = vst.msk [vmem:[#allocation5] sm:$0x1] %vm37_vm0, %v438_v2 }
  0x1f   :  { %39 = vst.msk [vmem:[#allocation6] sm:$0x1] %vm37_vm0, %v438_v2  ;;  %v471_v3 = vsub.s32 %v190_v1, %v106_v0  ;;  %v142_v5 = vunpack.c.l.s4 %v439_v4  ;;  %v107_v7 = vsub.s32 0, %v106_v0  ;;  %v111_v8 = vsub.s32 1, %v106_v0 }
  0x20   :  { %v61_v44 = vadd.f32 %v60_v36, %v52_v30  ;;  %v68_v46 = vadd.f32 %v67_v39, %v53_v35  ;;  %v90_v54 = vadd.f32 %v89_v48, %v80_v37  ;;  %v97_v55 = vadd.f32 %v96_v49, %v81_v40 }
  0x21   :  { %v143_v6 = vunpack.c.0.s8 %v142_v5  ;;  %v115_v9 = vsub.s32 2, %v106_v0  ;;  %v119_v10 = vsub.s32 3, %v106_v0  ;;  %v123_v11 = vsub.s32 4, %v106_v0 }
  0x22   :  { %v62_v50 = vadd.f32 %v61_v44, %v54_v38  ;;  %v69_v52 = vadd.f32 %v68_v46, %v55_v43  ;;  %v91_v57 = vadd.f32 %v90_v54, %v82_v45  ;;  %v98_v58 = vadd.f32 %v97_v55, %v83_v47 }
  0x23   :  { %v127_v12 = vsub.s32 5, %v106_v0  ;;  %v131_v13 = vsub.s32 6, %v106_v0  ;;  %v135_v14 = vsub.s32 7, %v106_v0  ;;  %v473_v16 = vsub.s32 %v143_v6, %v106_v0 }
  0x24   :  { %v101_v56 = vadd.f32 %v69_v52, %v62_v50  ;;  %v92_v59 = vadd.f32 %v91_v57, %v84_v51  ;;  %v99_v60 = vadd.f32 %v98_v58, %v85_v53 }
  0x25   :  { %v100_v63 = vld [vmem:[#allocation5] sm:$0x1] }
  0x26   :  { %102 = vadd.xlane.f32.xlu0 %v101_v56  ;;  %v214_v61 = vadd.f32 %v99_v60, %v92_v59  ;;  %v213_v6 = vld [vmem:[#allocation6] sm:$0x1] }
  0x2a   :  { %215 = vadd.xlane.f32.xlu0 %v214_v61 }
  0xb3   :  { %v103_v15 = vpop.xlane.xlu0 %102 }
  0xb4   :  { %v108_v17 = vrot.slane %v103_v15, %v107_v7  ;;  %v112_v18 = vrot.slane %v103_v15, %v111_v8  ;;  %v116_v19 = vrot.slane %v103_v15, %v115_v9  ;;  %v120_v20 = vrot.slane %v103_v15, %v119_v10 }
  0xb5   :  { %v124_v21 = vrot.slane %v103_v15, %v123_v11  ;;  %v128_v22 = vrot.slane %v103_v15, %v127_v12  ;;  %v132_v23 = vrot.slane %v103_v15, %v131_v13  ;;  %v136_v24 = vrot.slane %v103_v15, %v135_v14 }
  0xb6   :  { %v137_v25 = vcombine.low %v108_v17, %v112_v18  ;;  %v138_v26 = vcombine.low %v116_v19, %v120_v20 }
  0xb7   :  { %v216_v27 = vpop.xlane.xlu0 %215  ;;  %v139_v28 = vcombine.low %v124_v21, %v128_v22  ;;  %v140_v29 = vcombine.low %v132_v23, %v136_v24 }
  0xb8   :  { %v147_v30 = vrot.slane %v137_v25, %v473_v16  ;;  %v154_v31 = vrot.slane %v138_v26, %v473_v16  ;;  %v221_v32 = vrot.slane %v216_v27, %v107_v7  ;;  %v225_v33 = vrot.slane %v216_v27, %v111_v8 }
  0xb9   :  { %v161_v34 = vrot.slane %v139_v28, %v473_v16  ;;  %v168_v35 = vrot.slane %v140_v29, %v473_v16  ;;  %v229_v36 = vrot.slane %v216_v27, %v115_v9  ;;  %v233_v37 = vrot.slane %v216_v27, %v119_v10 }
  0xba   :  { %v169_v38 = vcombine.low %v147_v30, %v154_v31  ;;  %v237_v39 = vrot.slane %v216_v27, %v123_v11  ;;  %v241_v40 = vrot.slane %v216_v27, %v127_v12  ;;  %v245_v41 = vrot.slane %v216_v27, %v131_v13 }
  0xbb   :  { %v170_v42 = vcombine.low %v161_v34, %v168_v35  ;;  %v249_v43 = vrot.slane %v216_v27, %v135_v14  ;;  %v250_v44 = vcombine.low %v221_v32, %v225_v33  ;;  %v251_v45 = vcombine.low %v229_v36, %v233_v37 }
  0xbc   :  { %v177_v46 = vrot.slane %v169_v38, %v473_v16  ;;  %v252_v47 = vcombine.low %v237_v39, %v241_v40 }
  0xbd   :  { %v184_v48 = vrot.slane %v170_v42, %v473_v16  ;;  %v253_v49 = vcombine.low %v245_v41, %v249_v43  ;;  %v260_v50 = vrot.slane %v250_v44, %v473_v16  ;;  %v267_v51 = vrot.slane %v251_v45, %v473_v16 }
  0xbe   :  { %v274_v52 = vrot.slane %v252_v47, %v473_v16 }
  0xbf   :  { %v185_v53 = vcombine.low %v177_v46, %v184_v48  ;;  %v281_v54 = vrot.slane %v253_v49, %v473_v16  ;;  %v282_v55 = vcombine.low %v260_v50, %v267_v51 }
  0xc1   :  { %187 = vperm.xlu1 %360, %v185_v53   ;;  %v283_v56 = vcombine.low %v274_v52, %v281_v54  ;;  %v290_v57 = vrot.slane %v282_v55, %v473_v16 }
  0xc3   :  { %v297_v58 = vrot.slane %v283_v56, %v473_v16 }
  0xc5   :  { %v298_v59 = vcombine.low %v290_v57, %v297_v58 }
  0xc7   :  { %300 = vperm.xlu1 %360, %v298_v59  }
 0x140   :  { %v188_v60 = vpop.permute.xlu1 %187 }
 0x141   :  { %v194_v61 = vrot.slane %v188_v60, %v471_v3 }
 0x143   :  { %v201_v62 = vrot.slane %v194_v61, %v473_v16 }
 0x145   :  { %v208_v0 = vrot.slane %v201_v62, %v473_v16 }
 0x146   :  { %v301_v1 = vpop.permute.xlu1 %300 }
 0x147   :  { %v210_v2 = vadd.f32 %v208_v0, %v100_v63  ;;  %v305_v4 = vrot.slane %v301_v1, %v471_v3 }
 0x149   :  { %212 = vst.msk [vmem:[#allocation5] sm:$0x1] %vm37_vm0, %v210_v2  ;;  %v312_v5 = vrot.slane %v305_v4, %v473_v16 }
 0x14a   :  { %395 = shalt.err (!%p392_p12)
}
 0x14b   :  { %s396_s30 = scalar_lea.hbm %s520_s1, 16 }
 0x14c   :  { %p397_p13 = scmp.ne.s32.totalorder %s520_s1, %s396_s30  ;;  %p400_p0 = scmp.lt.u32.totalorder %s396_s30, %s520_s1 }
 0x14e   :  { %p402_p1 = pnand %p400_p0, %p397_p13 }
 0x150   :  { %405 = shalt.err (!%p402_p1)
}
 0x151   :  { %332 = dma.vmem_to_hbm [thread:$0]  %s330_s23, 16, %s520_s1, [#allocation4]   ;;  %v319_v3 = vrot.slane %v312_v5, %v473_v16 }
 0x152   :  { %s406_s9 = scalar_lea.vmem %s340_s25, 16  ;;  %s410_s10 = scalar_lea.vmem %s340_s25, 32 }
 0x153   :  { %v321_v7 = vadd.f32 %v319_v3, %v213_v6  ;;  %p407_p2 = scmp.ne.s32.totalorder %s340_s25, %s406_s9  ;;  %p411_p3 = scmp.lt.s32.totalorder %s340_s25, %s340_s25 }
 0x154   :  { %p412_p4 = scmp.lt.s32.totalorder %s410_s10, %s406_s9 }
 0x155   :  { %322 = vst.msk [vmem:[#allocation6] sm:$0x1] %vm37_vm0, %v321_v7 }
 0x156   :  { %p413_p5 = por %p412_p4, %p411_p3 }
 0x158   :  { %p414_p6 = pnand %p413_p5, %p407_p2 }
 0x15a   :  { %417 = shalt.err (!%p414_p6)
}
 0x15b   :  { %s418_s13 = scalar_lea.hbm %s521_s2, 16 }
 0x15c   :  { %p419_p7 = scmp.ne.s32.totalorder %s521_s2, %s418_s13  ;;  %p422_p8 = scmp.lt.u32.totalorder %s418_s13, %s521_s2 }
 0x15e   :  { %p424_p9 = pnand %p422_p8, %p419_p7 }
 0x160   :  { %427 = shalt.err (!%p424_p9)
}
 0x161   :  { %342 = dma.vmem_to_hbm [thread:$0]  %s340_s25, 16, %s521_s2, [#allocation7]  }
 0x162   :  { %430 = dma.done.wait [#allocation4], 16  }
 0x163   :  { %431 = vsyncadd [#allocation4], 4294967280 }
 0x164   :  { %432 = dma.done.wait [#allocation7], 16  }
 0x165   :  { %433 = vsyncadd [#allocation7], 4294967280 }
 0x166   :  { %349 = vsyncpa [#allocation3], 1 }
 0x167   :  { %350 = vsyncpa [#allocation4], 1 }
 0x168   :  { %351 = vsyncpa [#allocation7], 1 }

</bundles_post_ra>
